<compile_context>
chip_gen: v7x
topology: tpu7x:2x2x1
jax: 0.10.0
libtpu: 0.0.40
codegen_flags: <defaults>
</compile_context>

<pallas_src>
import jax
import jax.numpy as jnp
from jax.experimental import pallas as pl
from jax.experimental.pallas import tpu as pltpu

IN_FEATS = 20
HIDDEN = 256
OUT_FEATS = 10
OUT_PAD = 128  # lane-dense padded output width


def mlp_kernel(x_ref, w1_ref, b1_ref, w2_ref, b2_ref, o_ref):
    # hidden = relu(x @ W1^T + b1) -- bf16 operands on the MXU, f32 accumulation.
    x = x_ref[...].astype(jnp.bfloat16)
    h = jnp.dot(x, w1_ref[...], preferred_element_type=jnp.float32)
    h = jnp.maximum(h + b1_ref[...], 0.0)
    # out = hidden @ W2^T + b2  (W2^T / b2 zero-padded to 128 lanes -> dense store).
    out = jnp.dot(h.astype(jnp.bfloat16), w2_ref[...],
                  preferred_element_type=jnp.float32)
    o_ref[...] = (out + b2_ref[...]).astype(o_ref.dtype)


def mlp_forward(x, w1, b1, w2, b2, *, tm=None):
    """x: (B, 20); w1: (256, 20); b1: (256,); w2: (10, 256); b2: (10,)."""
    B = x.shape[0]
    # Large, 8-aligned batch tile; cap keeps per-step VMEM tiny on every TPU gen.
    if tm is None:
        tm = min(1024, ((B + 7) // 8) * 8)
    n_tiles = pl.cdiv(B, tm)
    B_pad = n_tiles * tm
    if B_pad != B:
        x = jnp.pad(x, ((0, B_pad - B), (0, 0)))

    # PyTorch Linear weights are (out, in); pre-transpose to (in, out) and cast
    # to bf16 for the MXU. Pad layer-2 outputs 10 -> 128 lanes with zeros.
    w1t = w1.T.astype(jnp.bfloat16)                                  # (20, 256)
    w2t = jnp.zeros((HIDDEN, OUT_PAD), jnp.bfloat16)
    w2t = w2t.at[:, :OUT_FEATS].set(w2.T.astype(jnp.bfloat16))       # (256, 128)
    b1_2d = b1.reshape(1, HIDDEN).astype(jnp.float32)                # (1, 256)
    b2_2d = jnp.zeros((1, OUT_PAD), jnp.float32)
    b2_2d = b2_2d.at[:, :OUT_FEATS].set(
        b2.reshape(1, OUT_FEATS).astype(jnp.float32))                # (1, 128)

    out_padded = pl.pallas_call(
        mlp_kernel,
        out_shape=jax.ShapeDtypeStruct((B_pad, OUT_PAD), jnp.float32),
        grid=(n_tiles,),
        in_specs=[
            pl.BlockSpec((tm, IN_FEATS), lambda i: (i, 0)),      # streamed x
            pl.BlockSpec((IN_FEATS, HIDDEN), lambda i: (0, 0)),  # resident W1^T
            pl.BlockSpec((1, HIDDEN), lambda i: (0, 0)),         # resident b1
            pl.BlockSpec((HIDDEN, OUT_PAD), lambda i: (0, 0)),   # resident W2^T
            pl.BlockSpec((1, OUT_PAD), lambda i: (0, 0)),        # resident b2
        ],
        out_specs=pl.BlockSpec((tm, OUT_PAD), lambda i: (i, 0)),
        compiler_params=pltpu.CompilerParams(
            dimension_semantics=("parallel",)),
    )(x, w1t, b1_2d, w2t, b2_2d)

    # Drop batch padding and the 118 zero output columns.
    return out_padded[:B, :OUT_FEATS]


def init_params(key):
    """Deterministic init mimicking PyTorch Linear default (uniform +-1/sqrt(fan_in))."""
    k1, k2, k3, k4 = jax.random.split(key, 4)
    bound1 = 1.0 / jnp.sqrt(20.0)
    bound2 = 1.0 / jnp.sqrt(256.0)
    w1 = jax.random.uniform(k1, (256, 20), jnp.float32, -bound1, bound1)
    b1 = jax.random.uniform(k2, (256,), jnp.float32, -bound1, bound1)
    w2 = jax.random.uniform(k3, (10, 256), jnp.float32, -bound2, bound2)
    b2 = jax.random.uniform(k4, (10,), jnp.float32, -bound2, bound2)
    return w1, b1, w2, b2


if __name__ == "__main__":
    key = jax.random.PRNGKey(0)
    kx, kp = jax.random.split(key)

    B = 8
    x = jax.random.normal(kx, (B, IN_FEATS), jnp.float32)
    w1, b1, w2, b2 = init_params(kp)

    out = mlp_forward(x, w1, b1, w2, b2)
    out = jax.block_until_ready(out)

    # Pure-JAX f32 reference; tolerance loosened for bf16 MXU operand rounding.
    ref = jnp.maximum(x @ w1.T + b1, 0.0) @ w2.T + b2
    assert out.shape == (B, OUT_FEATS)
    assert jnp.allclose(out, ref, atol=2e-2, rtol=2e-2)

    print("KERNEL_OK")
</pallas_src>

<mosaic_0001>
module attributes {stable_mosaic.version = 11 : i64} {
  func.func @mlp_kernel(%arg0: i32, %arg1: memref<8x20xf32, #tpu.memory_space<vmem>>, %arg2: memref<20x256xbf16, #tpu.memory_space<vmem>>, %arg3: memref<1x256xf32, #tpu.memory_space<vmem>>, %arg4: memref<256x128xbf16, #tpu.memory_space<vmem>>, %arg5: memref<1x128xf32, #tpu.memory_space<vmem>>, %arg6: memref<8x128xf32, #tpu.memory_space<vmem>>) attributes {dimension_semantics = [#tpu.dimension_semantics<parallel>], iteration_bounds = array<i64: 1>, scalar_prefetch = 0 : i64, scratch_operands = 0 : i64, tpu.core_type = #tpu.core_type<tc>, window_params = [{transform_indices = @transform_0, window_bounds = array<i64: 8, 20>}, {pipeline_mode = #tpu.pipeline_mode<synchronous>, transform_indices = @transform_1, window_bounds = array<i64: 20, 256>}, {pipeline_mode = #tpu.pipeline_mode<synchronous>, transform_indices = @transform_2, window_bounds = array<i64: 1, 256>}, {pipeline_mode = #tpu.pipeline_mode<synchronous>, transform_indices = @transform_3, window_bounds = array<i64: 256, 128>}, {pipeline_mode = #tpu.pipeline_mode<synchronous>, transform_indices = @transform_4, window_bounds = array<i64: 1, 128>}, {transform_indices = @transform_5, window_bounds = array<i64: 8, 128>}]} {
    %c0 = arith.constant 0 : index
    %c0_0 = arith.constant 0 : index
    %0 = vector.load %arg1[%c0, %c0_0] : memref<8x20xf32, #tpu.memory_space<vmem>>, vector<8x20xf32>
    %1 = arith.truncf %0 : vector<8x20xf32> to vector<8x20xbf16>
    %c0_1 = arith.constant 0 : index
    %c0_2 = arith.constant 0 : index
    %2 = vector.load %arg2[%c0_1, %c0_2] : memref<20x256xbf16, #tpu.memory_space<vmem>>, vector<20x256xbf16>
    %cst = arith.constant dense<0.000000e+00> : vector<8x256xf32>
    %3 = tpu.matmul %1, %2, %cst {dimension_numbers = #tpu.dot_dimension_numbers<[1], [0], [0], [1], [0, 0, 1, 1], [], []>} : vector<8x20xbf16>, vector<20x256xbf16>, vector<8x256xf32> -> vector<8x256xf32>
    %c0_3 = arith.constant 0 : index
    %c0_4 = arith.constant 0 : index
    %4 = vector.load %arg3[%c0_3, %c0_4] : memref<1x256xf32, #tpu.memory_space<vmem>>, vector<1x256xf32>
    %5 = vector.broadcast %4 : vector<1x256xf32> to vector<8x256xf32>
    %6 = arith.addf %3, %5 : vector<8x256xf32>
    %cst_5 = arith.constant 0.000000e+00 : f32
    %7 = vector.broadcast %cst_5 : f32 to vector<8x256xf32>
    %8 = arith.maximumf %6, %7 : vector<8x256xf32>
    %9 = arith.truncf %8 : vector<8x256xf32> to vector<8x256xbf16>
    %c0_6 = arith.constant 0 : index
    %c0_7 = arith.constant 0 : index
    %10 = vector.load %arg4[%c0_6, %c0_7] : memref<256x128xbf16, #tpu.memory_space<vmem>>, vector<256x128xbf16>
    %cst_8 = arith.constant dense<0.000000e+00> : vector<8x128xf32>
    %11 = tpu.matmul %9, %10, %cst_8 {dimension_numbers = #tpu.dot_dimension_numbers<[1], [0], [0], [1], [0, 0, 1, 1], [], []>} : vector<8x256xbf16>, vector<256x128xbf16>, vector<8x128xf32> -> vector<8x128xf32>
    %c0_9 = arith.constant 0 : index
    %c0_10 = arith.constant 0 : index
    %12 = vector.load %arg5[%c0_9, %c0_10] : memref<1x128xf32, #tpu.memory_space<vmem>>, vector<1x128xf32>
    %13 = vector.broadcast %12 : vector<1x128xf32> to vector<8x128xf32>
    %14 = arith.addf %11, %13 : vector<8x128xf32>
    %c0_11 = arith.constant 0 : index
    %c0_12 = arith.constant 0 : index
    %15 = vector.load %arg6[%c0_11, %c0_12] : memref<8x128xf32, #tpu.memory_space<vmem>>, vector<8x128xf32>
    tpu.vector_store %arg6[%c0_11, %c0_12], %14 {strides = array<i32>} : memref<8x128xf32, #tpu.memory_space<vmem>>, vector<8x128xf32>,
    return
  }
  func.func @transform_0(%arg0: i32) -> (i32, i32) {
    %c0_i32 = arith.constant 0 : i32
    %c0_i32_0 = arith.constant 0 : i32
    return %arg0, %c0_i32 : i32, i32
  }
  func.func @transform_1(%arg0: i32) -> (i32, i32) {
    %c0_i32 = arith.constant 0 : i32
    %c0_i32_0 = arith.constant 0 : i32
    %c0_i32_1 = arith.constant 0 : i32
    return %c0_i32, %c0_i32_0 : i32, i32
  }
  func.func @transform_2(%arg0: i32) -> (i32, i32) {
    %c0_i32 = arith.constant 0 : i32
    %c0_i32_0 = arith.constant 0 : i32
    %c0_i32_1 = arith.constant 0 : i32
    return %c0_i32, %c0_i32_0 : i32, i32
  }
  func.func @transform_3(%arg0: i32) -> (i32, i32) {
    %c0_i32 = arith.constant 0 : i32
    %c0_i32_0 = arith.constant 0 : i32
    %c0_i32_1 = arith.constant 0 : i32
    return %c0_i32, %c0_i32_0 : i32, i32
  }
  func.func @transform_4(%arg0: i32) -> (i32, i32) {
    %c0_i32 = arith.constant 0 : i32
    %c0_i32_0 = arith.constant 0 : i32
    %c0_i32_1 = arith.constant 0 : i32
    return %c0_i32, %c0_i32_0 : i32, i32
  }
  func.func @transform_5(%arg0: i32) -> (i32, i32) {
    %c0_i32 = arith.constant 0 : i32
    %c0_i32_0 = arith.constant 0 : i32
    return %arg0, %c0_i32 : i32, i32
  }
}

</mosaic_0001>

<bundles_post_ra>
// kernel: tpu_custom_call.1
= control target key start
LH: loop header
LB: loop body
LE: loop exit
PB: predicated region body
PF: predicated region fallthrough
CT: control target
= control target key end

     0   :  { %10 = vsyncpa [#allocation3], 0  ;;  %s603_s0 = inlined_call_operand.hbm [shape: f32[8,20], index: 0, kind: input, shape index: {}]   ;;  %s604_s1 = inlined_call_operand.hbm [shape: bf16[20,256], index: 1, kind: input, shape index: {}]   ;;  %s605_s2 = inlined_call_operand.vmem [shape: f32[1,256], index: 2, kind: input, shape index: {}]   ;;  %s606_s3 = inlined_call_operand.hbm [shape: bf16[256,128], index: 3, kind: input, shape index: {}]   ;;  %s607_s4 = inlined_call_operand.vmem [shape: f32[1,128], index: 4, kind: input, shape index: {}]   ;;  %s608_s5 = inlined_call_operand.hbm [shape: f32[8,128], index: 5, kind: output, shape index: {}]  }
   0x1   :  { %11 = vsyncpa [#allocation6], 0 }
   0x2   :  { %12 = vsyncpa [#allocation4], 0  ;;  %s510_s18 = smov [#allocation5]   ;;  %s416_s22 = scalar_lea.hbm %s604_s1, 384 }
   0x3   :  { %s28_s19 = sshll.u32 %s510_s18, 4  ;;  %p417_p0 = scmp.ne.s32.totalorder %s604_s1, %s416_s22  ;;  %s29_s19 = int_to_ptr.vmem [resolvable:$true] %s28_s19 }
   0x4   :  { %p420_p1 = scmp.lt.u32.totalorder %s416_s22, %s604_s1 }
   0x6   :  { %p422_p2 = pnand %p420_p1, %p417_p0 }
   0x8   :  { %425 = shalt.err (!%p422_p2)
}
   0x9   :  { %s426_s27 = scalar_lea.vmem %s29_s19, 384  ;;  %p431_p4 = scmp.lt.s32.totalorder %s29_s19, %s29_s19 }
   0xa   :  { %p427_p3 = scmp.ne.s32.totalorder %s29_s19, %s426_s27  ;;  %p432_p5 = scmp.lt.s32.totalorder %s426_s27, %s426_s27 }
   0xc   :  { %p433_p6 = por %p432_p5, %p431_p4 }
   0xe   :  { %p434_p7 = pnand %p433_p6, %p427_p3 }
  0x10   :  { %437 = shalt.err (!%p434_p7)
}
  0x11   :  { %s511_s28 = smov 128   ;;  %s512_s29 = smov 8  }
  0x12   :  { %34 = dma.hbm_to_vmem [thread:$0]  %s604_s1, 384, %s29_s19, [#allocation6], %s511_s28, %s511_s28, %s512_s29  }
  0x13   :  { %s513_s7 = smov [#allocation2]   ;;  %s514_s9 = smov [#allocation7]  }
  0x14   :  { %s19_s8 = sshll.u32 %s513_s7, 4  ;;  %s42_s10 = sshll.u32 %s514_s9, 4  ;;  %s20_s8 = int_to_ptr.vmem [resolvable:$true] %s19_s8  ;;  %s43_s10 = int_to_ptr.vmem [resolvable:$true] %s42_s10 }
  0x15   :  { %s438_s13 = scalar_lea.hbm %s603_s0, 128 }
  0x16   :  { %p439_p8 = scmp.ne.s32.totalorder %s603_s0, %s438_s13  ;;  %p442_p9 = scmp.lt.u32.totalorder %s438_s13, %s603_s0 }
  0x18   :  { %p444_p10 = pnand %p442_p9, %p439_p8 }
  0x1a   :  { %447 = shalt.err (!%p444_p10)
}
  0x1b   :  { %s448_s1 = scalar_lea.vmem %s20_s8, 128  ;;  %p453_p12 = scmp.lt.s32.totalorder %s20_s8, %s20_s8 }
  0x1c   :  { %p449_p11 = scmp.ne.s32.totalorder %s20_s8, %s448_s1  ;;  %p454_p13 = scmp.lt.s32.totalorder %s448_s1, %s448_s1 }
  0x1e   :  { %p455_p0 = por %p454_p13, %p453_p12 }
  0x20   :  { %p456_p1 = pnand %p455_p0, %p449_p11 }
  0x22   :  { %459 = shalt.err (!%p456_p1)
}
  0x23   :  { %22 = dma.hbm_to_vmem [thread:$0]  %s603_s0, 128, %s20_s8, [#allocation3]  }
  0x24   :  { %s460_s22 = scalar_lea.hbm %s606_s3, 2048 }
  0x25   :  { %p461_p2 = scmp.ne.s32.totalorder %s606_s3, %s460_s22  ;;  %p464_p3 = scmp.lt.u32.totalorder %s460_s22, %s606_s3 }
  0x27   :  { %p466_p4 = pnand %p464_p3, %p461_p2 }
  0x29   :  { %469 = shalt.err (!%p466_p4)
}
  0x2a   :  { %s470_s27 = scalar_lea.vmem %s43_s10, 2048  ;;  %p475_p6 = scmp.lt.s32.totalorder %s43_s10, %s43_s10 }
  0x2b   :  { %p471_p5 = scmp.ne.s32.totalorder %s43_s10, %s470_s27  ;;  %p476_p7 = scmp.lt.s32.totalorder %s470_s27, %s470_s27 }
  0x2d   :  { %p477_p8 = por %p476_p7, %p475_p6 }
  0x2f   :  { %p478_p9 = pnand %p477_p8, %p471_p5 }
  0x31   :  { %481 = shalt.err (!%p478_p9)
}
  0x32   :  { %s515_s0 = smov 64   ;;  %s516_s28 = smov 4  }
  0x33   :  { %48 = dma.hbm_to_vmem [thread:$0]  %s606_s3, 2048, %s43_s10, [#allocation6], %s515_s0, %s515_s0, %s516_s28  }
  0x34   :  { %504 = dma.done.wait [#allocation3], 128  }
  0x35   :  { %505 = vsyncadd [#allocation3], 4294967168 }
  0x36   :  { %506 = dma.done.wait [#allocation6], 2432  }
  0x37   :  { %507 = vsyncadd [#allocation6], 4294964864  ;;  %v517_v0 = vmov 0   ;;  %v395_v1 = vld [vmem:[#allocation5 + $0x4] ss:$8 sps:$4 sm:$0xff]   ;;  %vm97_vm0 = vcmask 1041408   ;;  %v68_v25 = vlaneseq }
  0x38   :  { %136 = vmatprep.mubr.bf16.mxu0 %v517_v0  ;;  %v397_v2 = vld [vmem:[#allocation5] ss:$8 sps:$4 sm:$0xff]   ;;  %v65_v3 = vld [vmem:[#allocation5 + $0x10] sm:$0x33]  ;;  %v61_v4 = vld [vmem:[#allocation2] sm:$0xff]  ;;  %104 = vmatprep.subr.bf16.mxu0 %v395_v1  ;;  %vm93_vm1 = vcmask 162816  }
  0x39   :  { %v344_v5 = vcombine.high %v65_v3, %v65_v3  ;;  %v343_v6 = vcombine.low %v65_v3, %v65_v3  ;;  %v400_v7 = vld [vmem:[#allocation7 + $0x40] sm:$0xff]   ;;  %105 = vmatpush1.bf16.msra.mxu0 %v397_v2  ;;  %v402_v10 = vld [vmem:[#allocation7 + $0x48] sm:$0xff]   ;;  %v62_v12 = vpack.c.bf16 %v61_v4, %v61_v4  ;;  %v404_v13 = vld [vmem:[#allocation7 + $0x50] sm:$0xff]   ;;  %v69_v26 = vshrl.u32 %v68_v25, 7 }
  0x3a   :  { %v401_v8 = vld [vmem:[#allocation7] sm:$0xff]   ;;  %364 = vmatprep.subr.bf16.mxu1 %v400_v7  ;;  %v403_v11 = vld [vmem:[#allocation7 + $0x8] sm:$0xff]   ;;  %v405_v14 = vld [vmem:[#allocation7 + $0x10] sm:$0xff]  }
  0x3b   :  { %345 = vmatprep.subr.msk.bf16.mxu0 %vm97_vm0, %v344_v5  ;;  %v99_v9 = vsel %vm97_vm0, %v343_v6, 0  ;;  %365 = vmatpush3.bf16.msra.mxu1 %v401_v8  ;;  %v406_v15 = vld [vmem:[#allocation7 + $0x58] sm:$0xff]   ;;  %v408_v17 = vld [vmem:[#allocation7 + $0x60] sm:$0xff]   ;;  %v410_v19 = vld [vmem:[#allocation7 + $0x68] sm:$0xff]   ;;  %v70_v27 = vsub.s32 0, %v69_v26  ;;  %v74_v29 = vsub.s32 1, %v69_v26 }
  0x3c   :  { %366 = vmatprep.subr.bf16.mxu1 %v402_v10  ;;  %v407_v16 = vld [vmem:[#allocation7 + $0x18] sm:$0xff]   ;;  %v409_v18 = vld [vmem:[#allocation7 + $0x20] sm:$0xff]   ;;  %v411_v20 = vld [vmem:[#allocation7 + $0x28] sm:$0xff]  }
  0x3d   :  { %107 = vmatpush1.bf16.msra.mxu0 %v99_v9  ;;  %v412_v21 = vld [vmem:[#allocation7 + $0x70] sm:$0xff]   ;;  %v414_v23 = vld [vmem:[#allocation7 + $0x78] sm:$0xff]   ;;  %v66_v28 = vld [vmem:[%s605_s2] sm:$0x3]  ;;  %s518_s2 = smov [#allocation8]  }
  0x3e   :  { %v413_v22 = vld [vmem:[#allocation7 + $0x30] sm:$0xff]   ;;  %v415_v24 = vld [vmem:[#allocation7 + $0x38] sm:$0xff]   ;;  %v71_v30 = vrot.slane %v66_v28, %v70_v27  ;;  %v75_v31 = vrot.slane %v66_v28, %v74_v29  ;;  %v347_v43 = vld [vmem:[%s607_s4] ss:$0 sm:$0xff]  ;;  %s331_s9 = sshll.u32 %s518_s2, 4  ;;  %s332_s9 = int_to_ptr.vmem [resolvable:$true] %s331_s9 }
  0x3f   :  { %367 = vmatpush3.bf16.msra.mxu1 %v403_v11  ;;  %s482_s10 = scalar_lea.vmem %s332_s9, 128  ;;  %p487_p11 = scmp.lt.s32.totalorder %s332_s9, %s332_s9 }
  0x40   :  { %346 = vmatmul.mubr.msk.bf16.vlgmr.msra.gmra.mrb[0].mxu0 %vm93_vm1, %v62_v12  ;;  %368 = vmatprep.subr.bf16.mxu1 %v404_v13  ;;  %p483_p10 = scmp.ne.s32.totalorder %s332_s9, %s482_s10  ;;  %p488_p12 = scmp.lt.s32.totalorder %s482_s10, %s482_s10 }
  0x42   :  { %p489_p13 = por %p488_p12, %p487_p11 }
  0x43   :  { %369 = vmatpush3.bf16.msra.mxu1 %v405_v14 }
  0x44   :  { %370 = vmatprep.subr.bf16.mxu1 %v406_v15  ;;  %p490_p0 = pnand %p489_p13, %p483_p10 }
  0x47   :  { %371 = vmatpush3.bf16.msra.mxu1 %v407_v16 }
  0x48   :  { %372 = vmatprep.subr.bf16.mxu1 %v408_v17 }
  0x4b   :  { %373 = vmatpush3.bf16.msra.mxu1 %v409_v18 }
  0x4c   :  { %374 = vmatprep.subr.bf16.mxu1 %v410_v19 }
  0x4f   :  { %375 = vmatpush3.bf16.msra.mxu1 %v411_v20 }
  0x50   :  { %376 = vmatprep.subr.bf16.mxu1 %v412_v21 }
  0x53   :  { %377 = vmatpush3.bf16.msra.mxu1 %v413_v22 }
  0x54   :  { %378 = vmatprep.subr.bf16.mxu1 %v414_v23 }
  0x57   :  { %379 = vmatpush3.bf16.msra.mxu1 %v415_v24 }
 0x113   :  { %v138_v32 = vpop.f32.mrb[0].mxu0 }
 0x114   :  { %v139_v33 = vadd.f32 %v138_v32, %v71_v30  ;;  %v140_v34 = vpop.f32.mrb[1].mxu0 }
 0x115   :  { %v141_v35 = vadd.f32 %v140_v34, %v75_v31  ;;  %v142_v36 = vpop.f32.mrb[2].mxu0 }
 0x116   :  { %v145_v37 = vmax.f32 %v139_v33, 0.0  ;;  %v143_v38 = vpop.f32.mrb[3].mxu0 }
 0x117   :  { %v146_v39 = vmax.f32 %v141_v35, 0.0 }
 0x118   :  { %v147_v41 = vpack.c.bf16 %v145_v37, %v145_v37 }
 0x119   :  { %v148_v40 = vpack.c.bf16 %v146_v39, %v146_v39 }
 0x11b   :  { %316 = vmatprep.mubr.bf16.mxu1 %v148_v40 }
 0x11c   :  { %317 = vmatmul.mubr.bf16.vlgmr.msra.gmra.mrb[0].mxu1 %v147_v41 }
 0x1ef   :  { %v380_v42 = vpop.f32.mrb[0].mxu1 }
 0x1f0   :  { %v381_v44 = vpop.f32.mrb[1].mxu1 }
 0x1f1   :  { %v382_v45 = vadd.f32 %v381_v44, %v380_v42  ;;  %v383_v46 = vpop.f32.mrb[2].mxu1 }
 0x1f2   :  { %v384_v47 = vpop.f32.mrb[3].mxu1 }
 0x1f3   :  { %v319_v48 = vadd.f32 %v382_v45, %v347_v43 }
 0x1f5   :  { %324 = vst [vmem:[#allocation8] sm:$0xff] %v319_v48 }
 0x1f6   :  { %493 = shalt.err (!%p490_p0)
}
 0x1f7   :  { %s494_s4 = scalar_lea.hbm %s608_s5, 128 }
 0x1f8   :  { %p495_p1 = scmp.ne.s32.totalorder %s608_s5, %s494_s4  ;;  %p498_p2 = scmp.lt.u32.totalorder %s494_s4, %s608_s5 }
 0x1fa   :  { %p500_p3 = pnand %p498_p2, %p495_p1 }
 0x1fc   :  { %503 = shalt.err (!%p500_p3)
}
 0x1fd   :  { %334 = dma.vmem_to_hbm [thread:$0]  %s332_s9, 128, %s608_s5, [#allocation4]  }
 0x1fe   :  { %508 = dma.done.wait [#allocation4], 128  }
 0x1ff   :  { %509 = vsyncadd [#allocation4], 4294967168 }
 0x200   :  { %338 = vsyncpa [#allocation3], 1 }
 0x201   :  { %339 = vsyncpa [#allocation6], 1 }
 0x202   :  { %340 = vsyncpa [#allocation4], 1 }

</bundles_post_ra>
